<compile_context>
chip_gen: v7x
topology: tpu7x:2x2x1
jax: 0.10.0
libtpu: 0.0.40
codegen_flags: <defaults>
</compile_context>

<pallas_src>
import functools

import jax
import jax.numpy as jnp
from jax import lax
from jax.experimental import pallas as pl
from jax.experimental.pallas import tpu as pltpu


def _round_up(x: int, m: int) -> int:
    return (x + m - 1) // m * m


# --------------------------------------------------------------------------
# Prologue: dcol_m[i] = sum_d im[i, d] * s[i, d] - margin   -> (B_pad, 1) f32
# --------------------------------------------------------------------------
def _diag_kernel(im_ref, s_ref, dcol_ref, *, margin):
    prod = im_ref[...].astype(jnp.float32) * s_ref[...].astype(jnp.float32)
    dcol_ref[...] = jnp.sum(prod, axis=1, keepdims=True) - margin   # [T, 1]


# --------------------------------------------------------------------------
# Main kernel: one (TM, TN) scores tile + fused hinge costs, lane-dense
# (TM, 128) partial sums accumulated across the inner j axis.
# --------------------------------------------------------------------------
def _triplet_tile_kernel(im_ref, s_ref, dcol_ref, drow_ref, out_ref):
    j = pl.program_id(1)

    # scores tile on the MXU; s.T is absorbed into the contraction (no XLU
    # transpose) and operands go to the MXU in their stored dtype.
    scores = lax.dot_general(
        im_ref[...], s_ref[...],
        dimension_numbers=(((1,), (1,)), ((), ())),
        preferred_element_type=jnp.float32)                         # [TM, TN]

    d1m = dcol_ref[...]          # [TM, 1]  diag - margin (rows of this block)
    d2m = drow_ref[...]          # [1, TN]  diag - margin (+inf on padded cols)

    # Both hinge directions fused; margin already folded into d1m/d2m; the
    # diagonal / padding corrections happen analytically in the wrapper.
    cost = (jnp.maximum(scores - d1m, 0.0) +
            jnp.maximum(scores - d2m, 0.0))                          # [TM, TN]

    # VPU-only lane-chunk accumulation to a lane-dense (TM, 128) partial
    # (static 128-lane slices -> vreg-aligned, no XLU cross-lane reduce).
    tn = cost.shape[1]
    partial = cost[:, 0:128]
    for c in range(1, tn // 128):
        partial = partial + cost[:, c * 128:(c + 1) * 128]

    @pl.when(j == 0)
    def _():
        out_ref[...] = partial

    @pl.when(j != 0)
    def _():
        out_ref[...] += partial


# --------------------------------------------------------------------------
# Tile selection: lane-dense tiles, VMEM-budgeted, megacore-friendly.
# --------------------------------------------------------------------------
def _choose_tiles(B, D, itemsize, block_m, block_n, s_buffers, vmem_target):
    def vmem_bytes(tm, tn):
        return ((2 * tm + max(2, s_buffers) * tn) * D * itemsize   # im + s bufs
                + 3 * tm * tn * 4                                  # f32 temps
                + 2 * (tm * 128 + tm + tn) * 4)                    # acc + diag

    block_n = max(128, _round_up(block_n, 128))
    block_m = max(block_n, _round_up(block_m, block_n))

    if B <= block_n:                            # single (t, t) tile, grid (1,1)
        t = _round_up(max(B, 1), 128)
        while t > 128 and vmem_bytes(t, t) > vmem_target:
            t -= 128
        return t, t, _round_up(B, t), vmem_bytes(t, t)

    tn = block_n
    while tn > 128 and vmem_bytes(tn, tn) > vmem_target:
        tn -= 128
    b_pad = _round_up(B, tn)                    # pad to the *column* tile only
    nblk = b_pad // tn

    tm = tn
    for mult in range(block_m // tn, 1, -1):
        cand = mult * tn
        # must divide b_pad, fit VMEM, and keep >= 2 row tiles so the
        # "parallel" i axis can shard across both v7x TensorCores.
        if (nblk % mult == 0 and nblk // mult >= 2
                and vmem_bytes(cand, tn) <= vmem_target):
            tm = cand
            break
    return tm, tn, b_pad, vmem_bytes(tm, tn)


# --------------------------------------------------------------------------
# Wrapper
# --------------------------------------------------------------------------
def triplet_loss(s, im, margin=0.0, *, block_m=None, block_n=256,
                 s_buffers=2, compute_dtype=None):
    """TripletLoss.forward(s, im) with the module defaults
    (cosine sim, direction='all', cost_style='sum', max_violation=False).

    block_m : row (im) tile — resident across the inner j axis.  Default is
              512 for 4-byte inputs and 1024 for bf16/fp16 (roofline-sized for
              v6e/v7x; v5e also benefits from >= 256-512).
    block_n : column (s) tile streamed over the inner axis (default 256).
    s_buffers : >2 enables pl.Buffered multi-buffering on the streamed s block
              (only worth it if a profile shows exposed DMA).
    compute_dtype : optional cast of both operands at the wrapper boundary
              (e.g. jnp.bfloat16) — 4-8x MXU throughput / half the s traffic
              when the accuracy budget allows.
    """
    assert s.ndim == 2 and s.shape == im.shape
    B, D = s.shape
    margin = float(margin)

    if compute_dtype is not None and s.dtype != jnp.dtype(compute_dtype):
        s = s.astype(compute_dtype)
        im = im.astype(compute_dtype)

    itemsize = jnp.dtype(s.dtype).itemsize
    if block_m is None:
        block_m = 1024 if itemsize <= 2 else 512

    vmem_target = 36 << 20        # leaves headroom inside v7x's 64 MiB physical
    tm, tn, b_pad, vmem_est = _choose_tiles(
        B, D, itemsize, block_m, block_n, s_buffers, vmem_target)
    n_i, n_j = b_pad // tm, b_pad // tn
    pad = b_pad - B

    if pad:
        s = jnp.pad(s, ((0, pad), (0, 0)))       # padded rows are true zeros
        im = jnp.pad(im, ((0, pad), (0, 0)))

    vmem_limit = int(min(max(vmem_est * 5 // 4 + (2 << 20), 32 << 20), 48 << 20))

    # ---- diag prologue (tiny, O(B*D)); margin folded in once ----------------
    dcol_m = pl.pallas_call(
        functools.partial(_diag_kernel, margin=margin),
        out_shape=jax.ShapeDtypeStruct((b_pad, 1), jnp.float32),
        grid=(n_j,),
        in_specs=[pl.BlockSpec((tn, D), lambda i: (i, 0)),
                  pl.BlockSpec((tn, D), lambda i: (i, 0))],
        out_specs=pl.BlockSpec((tn, 1), lambda i: (i, 0)),
        compiler_params=pltpu.CompilerParams(
            dimension_semantics=("parallel",),
            vmem_limit_bytes=vmem_limit),
    )(im, s)

    # Lane-dense row view of (diag - margin).  +inf on padded columns makes the
    # cost_im hinge vanish exactly for padded columns inside the kernel.
    # (Kept as a tiny wrapper-side reshape: an in-kernel (T,1)->(1,T) relayout
    # buys <5% and adds lowering risk.)
    drow_m = dcol_m.reshape(1, b_pad)
    if pad:
        col_valid = (jnp.arange(b_pad) < B)[None, :]
        drow_m = jnp.where(col_valid, drow_m, jnp.inf)

    # ---- tiled hinge-cost kernel --------------------------------------------
    s_spec = pl.BlockSpec((tn, D), lambda i, j: (j, 0))
    if s_buffers > 2:
        s_spec = pl.BlockSpec((tn, D), lambda i, j: (j, 0),
                              pipeline_mode=pl.Buffered(s_buffers))

    cost_est = pl.CostEstimate(
        flops=2 * b_pad * b_pad * D + 6 * b_pad * b_pad,
        transcendentals=0,
        bytes_accessed=(1 + n_i) * b_pad * D * itemsize
                       + 4 * (b_pad * 128 + 2 * b_pad))

    partials = pl.pallas_call(
        _triplet_tile_kernel,
        out_shape=jax.ShapeDtypeStruct((b_pad, 128), jnp.float32),
        grid=(n_i, n_j),                          # i: score rows, j: score cols
        in_specs=[
            pl.BlockSpec((tm, D), lambda i, j: (i, 0)),   # im rows, resident over j
            s_spec,                                       # s rows, streamed over j
            pl.BlockSpec((tm, 1), lambda i, j: (i, 0)),   # diag-margin (rows)
            pl.BlockSpec((1, tn), lambda i, j: (0, j)),   # diag-margin (cols)
        ],
        out_specs=pl.BlockSpec((tm, 128), lambda i, j: (i, 0)),
        compiler_params=pltpu.CompilerParams(
            dimension_semantics=("parallel", "arbitrary"),
            vmem_limit_bytes=vmem_limit),
        cost_estimate=cost_est,
    )(im, s, dcol_m, drow_m)

    # ---- analytic corrections (wrapper, O(B)) -------------------------------
    relu_margin = jnp.maximum(jnp.float32(margin), jnp.float32(0.0))
    valid = partials[:B, :] if pad else partials   # drop padded-row outputs
    loss = jnp.sum(valid)
    # Diagonal hinge entries equal relu(margin) (scores[i,i]-diag[i] == 0 up to
    # MXU-vs-VPU accumulation eps) -> removed analytically, both directions.
    loss = loss - 2.0 * B * relu_margin
    if pad:
        # cost_s hinge of valid rows against zero-padded columns:
        #   pad copies per row of relu(margin - diag[i]) == relu(-dcol_m[i]).
        loss = loss - pad * jnp.sum(jnp.maximum(-dcol_m[:B, 0], 0.0))
    return loss


# --------------------------------------------------------------------------
# Pure-JAX reference (mirrors the PyTorch forward with defaults)
# --------------------------------------------------------------------------
def _reference_triplet_loss(s, im, margin=0.0):
    scores = im.astype(jnp.float32) @ s.astype(jnp.float32).T
    diag = jnp.diag(scores)
    eye = jnp.eye(scores.shape[0], dtype=bool)
    cost_s = jnp.where(eye, 0.0, jnp.maximum(margin + scores - diag[:, None], 0.0))
    cost_im = jnp.where(eye, 0.0, jnp.maximum(margin + scores - diag[None, :], 0.0))
    return jnp.sum(cost_s) + jnp.sum(cost_im)


if __name__ == "__main__":
    key = jax.random.PRNGKey(0)

    def _make(k, b, d):
        k1, k2 = jax.random.split(k)
        s = jax.random.normal(k1, (b, d), jnp.float32)
        im = jax.random.normal(k2, (b, d), jnp.float32)
        s = s / jnp.linalg.norm(s, axis=1, keepdims=True)
        im = im / jnp.linalg.norm(im, axis=1, keepdims=True)
        return s, im

    checks = [
        (8, 32, 0.0),     # single 128x128 tile, heavy zero-padding, margin=0
        (12, 32, 0.2),    # padding + margin corrections
        (300, 48, 0.2),   # 2x2 grid of 256 tiles, cross-j accumulation
        (800, 32, 0.1),   # asymmetric tiles (tm=512, tn=256), 2x4 grid
    ]
    k = key
    for b, d, m in checks:
        k, sub = jax.random.split(k)
        s, im = _make(sub, b, d)
        loss = jax.block_until_ready(triplet_loss(s, im, margin=m))
        ref = _reference_triplet_loss(s, im, margin=m)
        assert jnp.allclose(loss, ref, rtol=1e-3, atol=1e-2), (b, d, m, loss, ref)

    # bf16 MXU-operand path (wrapper-boundary cast); looser tolerance.
    k, sub = jax.random.split(k)
    s, im = _make(sub, 64, 32)
    loss = jax.block_until_ready(
        triplet_loss(s, im, margin=0.2, compute_dtype=jnp.bfloat16))
    ref = _reference_triplet_loss(s, im, margin=0.2)
    assert jnp.allclose(loss, ref, rtol=5e-2, atol=0.5), (loss, ref)

    print("KERNEL_OK")
</pallas_src>

<mosaic_0001>
module attributes {stable_mosaic.version = 11 : i64} {
  func.func @_diag_kernel(%arg0: i32, %arg1: memref<128x32xf32, #tpu.memory_space<vmem>>, %arg2: memref<128x32xf32, #tpu.memory_space<vmem>>, %arg3: memref<128x1xf32, #tpu.memory_space<vmem>>) attributes {dimension_semantics = [#tpu.dimension_semantics<parallel>], iteration_bounds = array<i64: 1>, scalar_prefetch = 0 : i64, scratch_operands = 0 : i64, tpu.core_type = #tpu.core_type<tc>, window_params = [{transform_indices = @transform_0, window_bounds = array<i64: 128, 32>}, {transform_indices = @transform_1, window_bounds = array<i64: 128, 32>}, {transform_indices = @transform_2, window_bounds = array<i64: 128, 1>}]} {
    %c0 = arith.constant 0 : index
    %c0_0 = arith.constant 0 : index
    %0 = vector.load %arg1[%c0, %c0_0] : memref<128x32xf32, #tpu.memory_space<vmem>>, vector<128x32xf32>
    %c0_1 = arith.constant 0 : index
    %c0_2 = arith.constant 0 : index
    %1 = vector.load %arg2[%c0_1, %c0_2] : memref<128x32xf32, #tpu.memory_space<vmem>>, vector<128x32xf32>
    %2 = arith.mulf %0, %1 : vector<128x32xf32>
    %cst = arith.constant dense<0.000000e+00> : vector<128xf32>
    %3 = vector.multi_reduction <add>, %2, %cst [1] : vector<128x32xf32> to vector<128xf32>
    %4 = vector.shape_cast %3 : vector<128xf32> to vector<128x1xf32>
    %cst_3 = arith.constant 0.000000e+00 : f32
    %5 = vector.broadcast %cst_3 : f32 to vector<128x1xf32>
    %6 = arith.subf %4, %5 : vector<128x1xf32>
    %c0_4 = arith.constant 0 : index
    %c0_5 = arith.constant 0 : index
    %7 = vector.load %arg3[%c0_4, %c0_5] : memref<128x1xf32, #tpu.memory_space<vmem>>, vector<128x1xf32>
    tpu.vector_store %arg3[%c0_4, %c0_5], %6 {strides = array<i32>} : memref<128x1xf32, #tpu.memory_space<vmem>>, vector<128x1xf32>,
    return
  }
  func.func @transform_0(%arg0: i32) -> (i32, i32) {
    %c0_i32 = arith.constant 0 : i32
    %c0_i32_0 = arith.constant 0 : i32
    return %arg0, %c0_i32 : i32, i32
  }
  func.func @transform_1(%arg0: i32) -> (i32, i32) {
    %c0_i32 = arith.constant 0 : i32
    %c0_i32_0 = arith.constant 0 : i32
    return %arg0, %c0_i32 : i32, i32
  }
  func.func @transform_2(%arg0: i32) -> (i32, i32) {
    %c0_i32 = arith.constant 0 : i32
    %c0_i32_0 = arith.constant 0 : i32
    return %arg0, %c0_i32 : i32, i32
  }
}

</mosaic_0001>

<bundles_post_ra>
// kernel: tpu_custom_call.1
= control target key start
LH: loop header
LB: loop body
LE: loop exit
PB: predicated region body
PF: predicated region fallthrough
CT: control target
= control target key end

     0   :  { %vm59_vm0 = vcmask 261120   ;;  %vm108_vm1 = vcmask 7168   ;;  %s320_s0 = inlined_call_operand.vmem [shape: f32[128,32], index: 0, kind: input, shape index: {}]   ;;  %s321_s1 = inlined_call_operand.vmem [shape: f32[128,32], index: 1, kind: input, shape index: {}]   ;;  %s322_s2 = inlined_call_operand.vmem [shape: f32[128,1], index: 2, kind: output, shape index: {}]  }
   0x1   :  { %v13_v0 = vld [vmem:[%s320_s0 + $0x10] sm:$0xff]  ;;  %v11_v2 = vld [vmem:[%s320_s0] sm:$0xff]  ;;  %v14_v5 = vld [vmem:[%s320_s0 + $0x18] sm:$0xff] }
   0x2   :  { %v29_v1 = vld [vmem:[%s321_s1 + $0x10] sm:$0xff]  ;;  %v27_v4 = vld [vmem:[%s321_s1] sm:$0xff]  ;;  %v30_v6 = vld [vmem:[%s321_s1 + $0x18] sm:$0xff] }
   0x3   :  { %v45_v3 = vmul.f32 %v29_v1, %v13_v0  ;;  %v43_v7 = vmul.f32 %v27_v4, %v11_v2  ;;  %v46_v8 = vmul.f32 %v30_v6, %v14_v5  ;;  %v12_v9 = vld [vmem:[%s320_s0 + $0x8] sm:$0xff]  ;;  %v15_v15 = vld [vmem:[%s320_s0 + $0x20] sm:$0xff]  ;;  %v18_v22 = vld [vmem:[%s320_s0 + $0x38] sm:$0xff] }
   0x4   :  { %v28_v10 = vld [vmem:[%s321_s1 + $0x8] sm:$0xff]  ;;  %v31_v16 = vld [vmem:[%s321_s1 + $0x20] sm:$0xff]  ;;  %v34_v23 = vld [vmem:[%s321_s1 + $0x38] sm:$0xff] }
   0x5   :  { %v16_v11 = vld [vmem:[%s320_s0 + $0x28] sm:$0xff]  ;;  %v66_v12 = vsel %vm59_vm0, %v45_v3, 0.0  ;;  %v44_v13 = vmul.f32 %v28_v10, %v12_v9  ;;  %v60_v17 = vsel %vm59_vm0, %v43_v7, 0.0  ;;  %v69_v18 = vsel %vm59_vm0, %v46_v8, 0.0  ;;  %v17_v24 = vld [vmem:[%s320_s0 + $0x30] sm:$0xff]  ;;  %v19_v32 = vld [vmem:[%s320_s0 + $0x40] sm:$0xff] }
   0x6   :  { %v32_v14 = vld [vmem:[%s321_s1 + $0x28] sm:$0xff]  ;;  %67 = vadd.xlane.f32.xlu1 %v66_v12  ;;  %61 = vadd.xlane.f32.xlu0 %v60_v17  ;;  %v47_v21 = vmul.f32 %v31_v16, %v15_v15  ;;  %v33_v25 = vld [vmem:[%s321_s1 + $0x30] sm:$0xff]  ;;  %v50_v27 = vmul.f32 %v34_v23, %v18_v22  ;;  %v35_v33 = vld [vmem:[%s321_s1 + $0x40] sm:$0xff] }
   0x7   :  { %v48_v19 = vmul.f32 %v32_v14, %v16_v11  ;;  %v63_v20 = vsel %vm59_vm0, %v44_v13, 0.0  ;;  %v49_v29 = vmul.f32 %v33_v25, %v17_v24  ;;  %v20_v30 = vld [vmem:[%s320_s0 + $0x48] sm:$0xff]  ;;  %v51_v37 = vmul.f32 %v35_v33, %v19_v32  ;;  %v22_v38 = vld [vmem:[%s320_s0 + $0x58] sm:$0xff]  ;;  %v21_v40 = vld [vmem:[%s320_s0 + $0x50] sm:$0xff] }
   0x8   :  { %v72_v28 = vsel %vm59_vm0, %v47_v21, 0.0  ;;  %v36_v31 = vld [vmem:[%s321_s1 + $0x48] sm:$0xff]  ;;  %v81_v34 = vsel %vm59_vm0, %v50_v27, 0.0  ;;  %v38_v39 = vld [vmem:[%s321_s1 + $0x58] sm:$0xff]  ;;  %v37_v41 = vld [vmem:[%s321_s1 + $0x50] sm:$0xff] }
   0x9   :  { %v75_v26 = vsel %vm59_vm0, %v48_v19, 0.0  ;;  %v52_v35 = vmul.f32 %v36_v31, %v20_v30  ;;  %v78_v36 = vsel %vm59_vm0, %v49_v29, 0.0  ;;  %v54_v43 = vmul.f32 %v38_v39, %v22_v38  ;;  %v24_v46 = vld [vmem:[%s320_s0 + $0x68] sm:$0xff]  ;;  %v23_v48 = vld [vmem:[%s320_s0 + $0x60] sm:$0xff]  ;;  %v26_v54 = vld [vmem:[%s320_s0 + $0x78] sm:$0xff] }
   0xa   :  { %70 = vadd.xlane.f32.xlu1 %v69_v18  ;;  %64 = vadd.xlane.f32.xlu0 %v63_v20  ;;  %v84_v44 = vsel %vm59_vm0, %v51_v37, 0.0  ;;  %v53_v45 = vmul.f32 %v37_v41, %v21_v40  ;;  %v40_v47 = vld [vmem:[%s321_s1 + $0x68] sm:$0xff]  ;;  %v39_v49 = vld [vmem:[%s321_s1 + $0x60] sm:$0xff]  ;;  %v42_v55 = vld [vmem:[%s321_s1 + $0x78] sm:$0xff] }
   0xb   :  { %v87_v42 = vsel %vm59_vm0, %v52_v35, 0.0  ;;  %v93_v50 = vsel %vm59_vm0, %v54_v43, 0.0  ;;  %v56_v51 = vmul.f32 %v40_v47, %v24_v46  ;;  %v55_v53 = vmul.f32 %v39_v49, %v23_v48  ;;  %v25_v56 = vld [vmem:[%s320_s0 + $0x70] sm:$0xff] }
   0xc   :  { %v90_v52 = vsel %vm59_vm0, %v53_v45, 0.0  ;;  %v41_v57 = vld [vmem:[%s321_s1 + $0x70] sm:$0xff]  ;;  %v58_v59 = vmul.f32 %v42_v55, %v26_v54 }
   0xd   :  { %v99_v58 = vsel %vm59_vm0, %v56_v51, 0.0  ;;  %v96_v60 = vsel %vm59_vm0, %v55_v53, 0.0  ;;  %v57_v61 = vmul.f32 %v41_v57, %v25_v56 }
   0xe   :  { %76 = vadd.xlane.f32.xlu1 %v75_v26  ;;  %73 = vadd.xlane.f32.xlu0 %v72_v28  ;;  %v105_v62 = vsel %vm59_vm0, %v58_v59, 0.0 }
   0xf   :  { %v102_v63 = vsel %vm59_vm0, %v57_v61, 0.0 }
  0x12   :  { %82 = vadd.xlane.f32.xlu1 %v81_v34  ;;  %79 = vadd.xlane.f32.xlu0 %v78_v36 }
  0x16   :  { %88 = vadd.xlane.f32.xlu1 %v87_v42  ;;  %85 = vadd.xlane.f32.xlu0 %v84_v44 }
  0x1a   :  { %94 = vadd.xlane.f32.xlu1 %v93_v50  ;;  %91 = vadd.xlane.f32.xlu0 %v90_v52 }
  0x1e   :  { %100 = vadd.xlane.f32.xlu1 %v99_v58  ;;  %97 = vadd.xlane.f32.xlu0 %v96_v60 }
  0x22   :  { %106 = vadd.xlane.f32.xlu1 %v105_v62  ;;  %103 = vadd.xlane.f32.xlu0 %v102_v63 }
  0x93   :  { %v68_v0 = vpop.xlane.xlu1 %67  ;;  %v62_v1 = vpop.xlane.xlu0 %61 }
  0x94   :  { %111 = vst.msk [vmem:[%s322_s2 + $0x10] sm:$0xff] %vm108_vm1, %v68_v0  ;;  %109 = vst.msk [vmem:[%s322_s2] sm:$0xff] %vm108_vm1, %v62_v1 }
  0x97   :  { %v71_v2 = vpop.xlane.xlu1 %70  ;;  %v65_v3 = vpop.xlane.xlu0 %64 }
  0x98   :  { %112 = vst.msk [vmem:[%s322_s2 + $0x18] sm:$0xff] %vm108_vm1, %v71_v2  ;;  %110 = vst.msk [vmem:[%s322_s2 + $0x8] sm:$0xff] %vm108_vm1, %v65_v3 }
  0x9b   :  { %v77_v4 = vpop.xlane.xlu1 %76  ;;  %v74_v5 = vpop.xlane.xlu0 %73 }
  0x9c   :  { %114 = vst.msk [vmem:[%s322_s2 + $0x28] sm:$0xff] %vm108_vm1, %v77_v4  ;;  %113 = vst.msk [vmem:[%s322_s2 + $0x20] sm:$0xff] %vm108_vm1, %v74_v5 }
  0x9f   :  { %v83_v6 = vpop.xlane.xlu1 %82  ;;  %v80_v7 = vpop.xlane.xlu0 %79 }
  0xa0   :  { %116 = vst.msk [vmem:[%s322_s2 + $0x38] sm:$0xff] %vm108_vm1, %v83_v6  ;;  %115 = vst.msk [vmem:[%s322_s2 + $0x30] sm:$0xff] %vm108_vm1, %v80_v7 }
  0xa3   :  { %v89_v8 = vpop.xlane.xlu1 %88  ;;  %v86_v9 = vpop.xlane.xlu0 %85 }
  0xa4   :  { %118 = vst.msk [vmem:[%s322_s2 + $0x48] sm:$0xff] %vm108_vm1, %v89_v8  ;;  %117 = vst.msk [vmem:[%s322_s2 + $0x40] sm:$0xff] %vm108_vm1, %v86_v9 }
  0xa7   :  { %v95_v10 = vpop.xlane.xlu1 %94  ;;  %v92_v11 = vpop.xlane.xlu0 %91 }
  0xa8   :  { %120 = vst.msk [vmem:[%s322_s2 + $0x58] sm:$0xff] %vm108_vm1, %v95_v10  ;;  %119 = vst.msk [vmem:[%s322_s2 + $0x50] sm:$0xff] %vm108_vm1, %v92_v11 }
  0xab   :  { %v101_v12 = vpop.xlane.xlu1 %100  ;;  %v98_v13 = vpop.xlane.xlu0 %97 }
  0xac   :  { %122 = vst.msk [vmem:[%s322_s2 + $0x68] sm:$0xff] %vm108_vm1, %v101_v12  ;;  %121 = vst.msk [vmem:[%s322_s2 + $0x60] sm:$0xff] %vm108_vm1, %v98_v13 }
  0xaf   :  { %v107_v14 = vpop.xlane.xlu1 %106  ;;  %v104_v15 = vpop.xlane.xlu0 %103 }
  0xb0   :  { %124 = vst.msk [vmem:[%s322_s2 + $0x78] sm:$0xff] %vm108_vm1, %v107_v14  ;;  %123 = vst.msk [vmem:[%s322_s2 + $0x70] sm:$0xff] %vm108_vm1, %v104_v15 }

</bundles_post_ra>
